<compile_context>
chip_gen: v6e
topology: v6e:2x2x1
jax: 0.10.0
libtpu: 0.0.40
codegen_flags: <defaults>
</compile_context>

<pallas_src>
import functools

import numpy as np

import jax
import jax.numpy as jnp
from jax import lax
from jax.experimental import pallas as pl
from jax.experimental.pallas import tpu as pltpu


def _instance_loss_kernel(rows_ref, cols_ref, o_ref, *, batch_size, n_total,
                          temperature):
    """One row tile: rows [off, off+TR) of z against all N_pad columns."""
    tr = rows_ref.shape[0]
    n_pad = cols_ref.shape[0]
    off = pl.program_id(0) * tr

    rows = rows_ref[...]
    # Fold 1/T into the small (TR, D) operand only (O(TR*D) multiplies).
    rows_s = rows * jnp.asarray(1.0 / temperature, dtype=rows.dtype)
    cols = cols_ref[...]                      # streamed to the MXU, no cast

    # A @ B^T on the MXU: contract the last dim of both operands, f32 accumulate.
    dn = (((1,), (1,)), ((), ()))
    sim = lax.dot_general(rows_s, cols, dn,
                          preferred_element_type=jnp.float32)    # (TR, N_pad)

    row_g = off + lax.broadcasted_iota(jnp.int32, (tr, n_pad), 0)
    col = lax.broadcasted_iota(jnp.int32, (tr, n_pad), 1)

    # Positive logit sim[i, (i+B) % N], extracted from the slab we already have.
    pos_col = jnp.where(row_g < batch_size, row_g + batch_size,
                        row_g - batch_size)
    pos = jnp.sum(jnp.where(col == pos_col, sim, 0.0), axis=-1, keepdims=True)

    # Exclude self-similarity (and any padded columns) from the logsumexp.
    invalid = col == row_g
    if n_pad > n_total:
        invalid = invalid | (col >= n_total)
    masked = jnp.where(invalid, jnp.float32(-1e30), sim)

    m = jnp.max(masked, axis=-1, keepdims=True)
    l = jnp.sum(jnp.exp(masked - m), axis=-1, keepdims=True)
    lse = m + jnp.log(l)

    per_row = lse - pos                                           # (TR, 1)
    if n_pad > n_total:                                           # zero padded rows
        per_row = jnp.where(row_g[:, :1] < n_total, per_row, 0.0)

    partial = jnp.sum(per_row)
    # Lane-dense per-tile output block; the wrapper reads [:, 0, 0].
    o_ref[...] = jnp.broadcast_to(partial, o_ref.shape).astype(o_ref.dtype)


def _round_up(x, m):
    return ((x + m - 1) // m) * m


def _vmem_capacity_bytes():
    try:
        return int(pltpu.get_tpu_info().vmem_capacity_bytes)
    except Exception:
        return 64 * 1024 * 1024          # conservative (v7x per-core VMEM)


def _pick_row_tile(n, d, itemsize, budget):
    """Largest MXU-aligned row tile whose per-step footprint fits the budget."""
    n_min = _round_up(max(n, 8), 8)
    candidates = [c for c in (512, 256, 128, 64, 32, 16, 8) if c <= n_min]
    if not candidates:
        candidates = [n_min]
    for tr in candidates:
        n_pad = _round_up(n, tr)
        resident = 2 * n_pad * d * itemsize     # columns (counted double-buffered
                                                # in case Buffered(1) is unavailable)
        row_bufs = 2 * tr * d * itemsize        # pipelined row tiles
        slabs = 4 * tr * n_pad * 4              # sim / masked / exp f32 temporaries
        if resident + row_bufs + slabs + (1 << 20) <= budget:
            return tr, n_pad
    # TODO(synk): for very large N*D where even single-buffered resident columns
    # exceed VMEM (esp. v7x 64 MiB), add a column grid axis with flash-style
    # online logsumexp instead of keeping all columns resident.
    tr = candidates[-1]
    return tr, _round_up(n, tr)


def _build_call(kernel, *, tr, d, n_pad, num_tiles, vmem_limit,
                single_buffer_cols):
    cols_kwargs = {}
    if single_buffer_cols:
        # Constant index_map => never re-DMA'd; one buffer is enough.
        cols_kwargs["pipeline_mode"] = pl.Buffered(1)
    grid_spec = pltpu.PrefetchScalarGridSpec(
        num_scalar_prefetch=0,
        grid=(num_tiles,),
        in_specs=[
            pl.BlockSpec((tr, d), lambda r: (r, 0)),                    # row tiles
            pl.BlockSpec((n_pad, d), lambda r: (0, 0), **cols_kwargs),  # resident cols
        ],
        out_specs=pl.BlockSpec((1, 8, 128), lambda r: (r, 0, 0)),
    )
    return pl.pallas_call(
        kernel,
        out_shape=jax.ShapeDtypeStruct((num_tiles, 8, 128), jnp.float32),
        grid_spec=grid_spec,
        compiler_params=pltpu.CompilerParams(
            # Per-tile outputs, no cross-step state -> row tiles can be sharded
            # across TensorCores (v7x megacore); harmless on v5e/v6e.
            dimension_semantics=("parallel",),
            vmem_limit_bytes=int(vmem_limit),
        ),
    )


def instance_loss(z_i, z_j, *, temperature):
    b, d = z_i.shape
    assert z_j.shape == (b, d)
    n_total = 2 * b

    # One wrapper-side concat (O(N*D) HBM, negligible vs O(N^2*D) compute) lets
    # every grid step run a single full-width (TR, D) x (D, N) matmul and one
    # logsumexp pass.
    z = jnp.concatenate([z_i, z_j], axis=0)

    itemsize = z.dtype.itemsize
    budget = int(0.70 * _vmem_capacity_bytes())
    tr, n_pad = _pick_row_tile(n_total, d, itemsize, budget)
    if n_pad > n_total:
        z = jnp.pad(z, ((0, n_pad - n_total), (0, 0)))
    num_tiles = n_pad // tr

    kernel = functools.partial(
        _instance_loss_kernel,
        batch_size=b, n_total=n_total, temperature=float(temperature),
    )

    def run(single_buffer_cols):
        call = _build_call(kernel, tr=tr, d=d, n_pad=n_pad, num_tiles=num_tiles,
                           vmem_limit=budget,
                           single_buffer_cols=single_buffer_cols)
        return jax.block_until_ready(call(z, z))

    try:
        parts = run(True)
    except Exception:        # pl.Buffered(1) unsupported on this JAX build
        parts = run(False)

    return jnp.sum(parts[:, 0, 0]) / jnp.float32(n_total)


def _reference_loss_np(z_i, z_j, batch_size, temperature):
    """float64 NumPy port of the PyTorch forward (precision-unambiguous)."""
    z = np.concatenate([np.asarray(z_i, np.float64),
                        np.asarray(z_j, np.float64)], axis=0)
    n = 2 * batch_size
    sim = (z @ z.T) / temperature
    idx = np.arange(n)
    pos = sim[idx, (idx + batch_size) % n]
    np.fill_diagonal(sim, -np.inf)
    m = sim.max(axis=-1, keepdims=True)
    lse = (m + np.log(np.exp(sim - m).sum(axis=-1, keepdims=True)))[:, 0]
    return float((lse - pos).sum() / n)


if __name__ == "__main__":
    batch_size = 8
    dim = 32
    temperature = 0.5

    key = jax.random.PRNGKey(0)
    k1, k2 = jax.random.split(key)
    z_i = jax.random.normal(k1, (batch_size, dim), dtype=jnp.float32)
    z_j = jax.random.normal(k2, (batch_size, dim), dtype=jnp.float32)

    loss = instance_loss(z_i, z_j, temperature=temperature)
    loss = float(jax.block_until_ready(loss))

    ref = _reference_loss_np(z_i, z_j, batch_size, temperature)
    assert abs(loss - ref) <= 1e-3 * max(1.0, abs(ref)), (loss, ref)

    print("KERNEL_OK")
</pallas_src>

<mosaic_0001>
module attributes {stable_mosaic.version = 11 : i64} {
  func.func @_instance_loss_kernel(%arg0: i32, %arg1: memref<16x32xf32, #tpu.memory_space<vmem>>, %arg2: memref<16x32xf32, #tpu.memory_space<vmem>>, %arg3: memref<1x8x128xf32, #tpu.memory_space<vmem>>) attributes {dimension_semantics = [#tpu.dimension_semantics<parallel>], iteration_bounds = array<i64: 1>, scalar_prefetch = 0 : i64, scratch_operands = 0 : i64, tpu.core_type = #tpu.core_type<tc>, window_params = [{transform_indices = @transform_0, window_bounds = array<i64: 16, 32>}, {pipeline_mode = #tpu.pipeline_mode<synchronous>, transform_indices = @transform_1, window_bounds = array<i64: 16, 32>}, {transform_indices = @transform_2, window_bounds = array<i64: 1, 8, 128>}]} {
    %c16_i32 = arith.constant 16 : i32
    %0 = arith.muli %arg0, %c16_i32 : i32
    %c0 = arith.constant 0 : index
    %c0_0 = arith.constant 0 : index
    %1 = vector.load %arg1[%c0, %c0_0] : memref<16x32xf32, #tpu.memory_space<vmem>>, vector<16x32xf32>
    %cst = arith.constant 2.000000e+00 : f32
    %2 = vector.broadcast %cst : f32 to vector<16x32xf32>
    %3 = arith.mulf %1, %2 : vector<16x32xf32>
    %c0_1 = arith.constant 0 : index
    %c0_2 = arith.constant 0 : index
    %4 = vector.load %arg2[%c0_1, %c0_2] : memref<16x32xf32, #tpu.memory_space<vmem>>, vector<16x32xf32>
    %cst_3 = arith.constant dense<0.000000e+00> : vector<16x16xf32>
    %5 = tpu.matmul %3, %4, %cst_3 {dimension_numbers = #tpu.dot_dimension_numbers<[1], [1], [0], [0], [0, 0, 1, 0], [], []>} : vector<16x32xf32>, vector<16x32xf32>, vector<16x16xf32> -> vector<16x16xf32>
    %6 = tpu.iota {dimensions = array<i32: 0>} : vector<16x16xi32>
    %7 = vector.broadcast %0 : i32 to vector<16x16xi32>
    %8 = arith.addi %7, %6 : vector<16x16xi32>
    %9 = tpu.iota {dimensions = array<i32: 1>} : vector<16x16xi32>
    %c8_i32 = arith.constant 8 : i32
    %10 = vector.broadcast %c8_i32 : i32 to vector<16x16xi32>
    %11 = arith.cmpi slt, %8, %10 : vector<16x16xi32>
    %c8_i32_4 = arith.constant 8 : i32
    %12 = vector.broadcast %c8_i32_4 : i32 to vector<16x16xi32>
    %13 = arith.addi %8, %12 : vector<16x16xi32>
    %c8_i32_5 = arith.constant 8 : i32
    %14 = vector.broadcast %c8_i32_5 : i32 to vector<16x16xi32>
    %15 = arith.subi %8, %14 : vector<16x16xi32>
    %16 = arith.select %11, %13, %15 : vector<16x16xi1>, vector<16x16xi32>
    %17 = arith.cmpi eq, %9, %16 : vector<16x16xi32>
    %cst_6 = arith.constant 0.000000e+00 : f32
    %18 = vector.broadcast %cst_6 : f32 to vector<16x16xf32>
    %19 = arith.select %17, %5, %18 : vector<16x16xi1>, vector<16x16xf32>
    %cst_7 = arith.constant dense<0.000000e+00> : vector<16xf32>
    %20 = vector.multi_reduction <add>, %19, %cst_7 [1] : vector<16x16xf32> to vector<16xf32>
    %21 = vector.shape_cast %20 : vector<16xf32> to vector<16x1xf32>
    %22 = arith.cmpi eq, %9, %8 : vector<16x16xi32>
    %cst_8 = arith.constant -1.000000e+30 : f32
    %23 = vector.broadcast %cst_8 : f32 to vector<16x16xf32>
    %24 = arith.select %22, %23, %5 : vector<16x16xi1>, vector<16x16xf32>
    %cst_9 = arith.constant dense<0xFF800000> : vector<16xf32>
    %25 = vector.multi_reduction <maximumf>, %24, %cst_9 [1] : vector<16x16xf32> to vector<16xf32>
    %26 = vector.shape_cast %25 : vector<16xf32> to vector<16x1xf32>
    %27 = vector.broadcast %26 : vector<16x1xf32> to vector<16x16xf32>
    %28 = arith.subf %24, %27 : vector<16x16xf32>
    %29 = math.exp %28 : vector<16x16xf32>
    %cst_10 = arith.constant dense<0.000000e+00> : vector<16xf32>
    %30 = vector.multi_reduction <add>, %29, %cst_10 [1] : vector<16x16xf32> to vector<16xf32>
    %31 = vector.shape_cast %30 : vector<16xf32> to vector<16x1xf32>
    %32 = math.log %31 : vector<16x1xf32>
    %33 = arith.addf %26, %32 : vector<16x1xf32>
    %34 = arith.subf %33, %21 : vector<16x1xf32>
    %35 = vector.shape_cast %34 : vector<16x1xf32> to vector<1x16x1xf32>
    %cst_11 = arith.constant dense<0.000000e+00> : vector<1xf32>
    %36 = vector.multi_reduction <add>, %35, %cst_11 [1, 2] : vector<1x16x1xf32> to vector<1xf32>
    %37 = vector.shape_cast %36 : vector<1xf32> to vector<1x1x1xf32>
    %38 = vector.extract %37[0, 0, 0] : f32 from vector<1x1x1xf32>
    %39 = vector.broadcast %38 : f32 to vector<1x8x128xf32>
    %c0_12 = arith.constant 0 : index
    %c0_13 = arith.constant 0 : index
    %c0_14 = arith.constant 0 : index
    %40 = vector.load %arg3[%c0_12, %c0_13, %c0_14] : memref<1x8x128xf32, #tpu.memory_space<vmem>>, vector<1x8x128xf32>
    tpu.vector_store %arg3[%c0_12, %c0_13, %c0_14], %39 {strides = array<i32>} : memref<1x8x128xf32, #tpu.memory_space<vmem>>, vector<1x8x128xf32>,
    return
  }
  func.func @transform_0(%arg0: i32) -> (i32, i32) {
    %c0_i32 = arith.constant 0 : i32
    %c0_i32_0 = arith.constant 0 : i32
    return %arg0, %c0_i32 : i32, i32
  }
  func.func @transform_1(%arg0: i32) -> (i32, i32) {
    %c0_i32 = arith.constant 0 : i32
    %c0_i32_0 = arith.constant 0 : i32
    %c0_i32_1 = arith.constant 0 : i32
    return %c0_i32, %c0_i32_0 : i32, i32
  }
  func.func @transform_2(%arg0: i32) -> (i32, i32, i32) {
    %c0_i32 = arith.constant 0 : i32
    %c0_i32_0 = arith.constant 0 : i32
    %c0_i32_1 = arith.constant 0 : i32
    return %arg0, %c0_i32, %c0_i32_0 : i32, i32, i32
  }
}

module attributes {stable_mosaic.version = 11 : i64} {
  func.func @_instance_loss_kernel(%arg0: i32, %arg1: memref<16x32xf32, #tpu.memory_space<vmem>>, %arg2: memref<16x32xf32, #tpu.memory_space<vmem>>, %arg3: memref<1x8x128xf32, #tpu.memory_space<vmem>>) attributes {dimension_semantics = [#tpu.dimension_semantics<parallel>], iteration_bounds = array<i64: 1>, scalar_prefetch = 0 : i64, scratch_operands = 0 : i64, tpu.core_type = #tpu.core_type<tc>, window_params = [{transform_indices = @transform_0, window_bounds = array<i64: 16, 32>}, {pipeline_mode = #tpu.pipeline_mode<synchronous>, transform_indices = @transform_1, window_bounds = array<i64: 16, 32>}, {transform_indices = @transform_2, window_bounds = array<i64: 1, 8, 128>}]} {
    %c16_i32 = arith.constant 16 : i32
    %0 = arith.muli %arg0, %c16_i32 : i32
    %c0 = arith.constant 0 : index
    %c0_0 = arith.constant 0 : index
    %1 = vector.load %arg1[%c0, %c0_0] : memref<16x32xf32, #tpu.memory_space<vmem>>, vector<16x32xf32>
    %cst = arith.constant 2.000000e+00 : f32
    %2 = vector.broadcast %cst : f32 to vector<16x32xf32>
    %3 = arith.mulf %1, %2 : vector<16x32xf32>
    %c0_1 = arith.constant 0 : index
    %c0_2 = arith.constant 0 : index
    %4 = vector.load %arg2[%c0_1, %c0_2] : memref<16x32xf32, #tpu.memory_space<vmem>>, vector<16x32xf32>
    %cst_3 = arith.constant dense<0.000000e+00> : vector<16x16xf32>
    %5 = tpu.matmul %3, %4, %cst_3 {dimension_numbers = #tpu.dot_dimension_numbers<[1], [1], [0], [0], [0, 0, 1, 0], [], []>} : vector<16x32xf32>, vector<16x32xf32>, vector<16x16xf32> -> vector<16x16xf32>
    %6 = tpu.iota {dimensions = array<i32: 0>} : vector<16x16xi32>
    %7 = vector.broadcast %0 : i32 to vector<16x16xi32>
    %8 = arith.addi %7, %6 : vector<16x16xi32>
    %9 = tpu.iota {dimensions = array<i32: 1>} : vector<16x16xi32>
    %c8_i32 = arith.constant 8 : i32
    %10 = vector.broadcast %c8_i32 : i32 to vector<16x16xi32>
    %11 = arith.cmpi slt, %8, %10 : vector<16x16xi32>
    %c8_i32_4 = arith.constant 8 : i32
    %12 = vector.broadcast %c8_i32_4 : i32 to vector<16x16xi32>
    %13 = arith.addi %8, %12 : vector<16x16xi32>
    %c8_i32_5 = arith.constant 8 : i32
    %14 = vector.broadcast %c8_i32_5 : i32 to vector<16x16xi32>
    %15 = arith.subi %8, %14 : vector<16x16xi32>
    %16 = arith.select %11, %13, %15 : vector<16x16xi1>, vector<16x16xi32>
    %17 = arith.cmpi eq, %9, %16 : vector<16x16xi32>
    %cst_6 = arith.constant 0.000000e+00 : f32
    %18 = vector.broadcast %cst_6 : f32 to vector<16x16xf32>
    %19 = arith.select %17, %5, %18 : vector<16x16xi1>, vector<16x16xf32>
    %cst_7 = arith.constant dense<0.000000e+00> : vector<16xf32>
    %20 = vector.multi_reduction <add>, %19, %cst_7 [1] : vector<16x16xf32> to vector<16xf32>
    %21 = vector.shape_cast %20 : vector<16xf32> to vector<16x1xf32>
    %22 = arith.cmpi eq, %9, %8 : vector<16x16xi32>
    %cst_8 = arith.constant -1.000000e+30 : f32
    %23 = vector.broadcast %cst_8 : f32 to vector<16x16xf32>
    %24 = arith.select %22, %23, %5 : vector<16x16xi1>, vector<16x16xf32>
    %cst_9 = arith.constant dense<0xFF800000> : vector<16xf32>
    %25 = vector.multi_reduction <maximumf>, %24, %cst_9 [1] : vector<16x16xf32> to vector<16xf32>
    %26 = vector.shape_cast %25 : vector<16xf32> to vector<16x1xf32>
    %27 = vector.broadcast %26 : vector<16x1xf32> to vector<16x16xf32>
    %28 = arith.subf %24, %27 : vector<16x16xf32>
    %29 = math.exp %28 : vector<16x16xf32>
    %cst_10 = arith.constant dense<0.000000e+00> : vector<16xf32>
    %30 = vector.multi_reduction <add>, %29, %cst_10 [1] : vector<16x16xf32> to vector<16xf32>
    %31 = vector.shape_cast %30 : vector<16xf32> to vector<16x1xf32>
    %32 = math.log %31 : vector<16x1xf32>
    %33 = arith.addf %26, %32 : vector<16x1xf32>
    %34 = arith.subf %33, %21 : vector<16x1xf32>
    %35 = vector.shape_cast %34 : vector<16x1xf32> to vector<1x16x1xf32>
    %cst_11 = arith.constant dense<0.000000e+00> : vector<1xf32>
    %36 = vector.multi_reduction <add>, %35, %cst_11 [1, 2] : vector<1x16x1xf32> to vector<1xf32>
    %37 = vector.shape_cast %36 : vector<1xf32> to vector<1x1x1xf32>
    %38 = vector.extract %37[0, 0, 0] : f32 from vector<1x1x1xf32>
    %39 = vector.broadcast %38 : f32 to vector<1x8x128xf32>
    %c0_12 = arith.constant 0 : index
    %c0_13 = arith.constant 0 : index
    %c0_14 = arith.constant 0 : index
    %40 = vector.load %arg3[%c0_12, %c0_13, %c0_14] : memref<1x8x128xf32, #tpu.memory_space<vmem>>, vector<1x8x128xf32>
    tpu.vector_store %arg3[%c0_12, %c0_13, %c0_14], %39 {strides = array<i32>} : memref<1x8x128xf32, #tpu.memory_space<vmem>>, vector<1x8x128xf32>,
    return
  }
  func.func @transform_0(%arg0: i32) -> (i32, i32) {
    %c0_i32 = arith.constant 0 : i32
    %c0_i32_0 = arith.constant 0 : i32
    return %arg0, %c0_i32 : i32, i32
  }
  func.func @transform_1(%arg0: i32) -> (i32, i32) {
    %c0_i32 = arith.constant 0 : i32
    %c0_i32_0 = arith.constant 0 : i32
    %c0_i32_1 = arith.constant 0 : i32
    return %c0_i32, %c0_i32_0 : i32, i32
  }
  func.func @transform_2(%arg0: i32) -> (i32, i32, i32) {
    %c0_i32 = arith.constant 0 : i32
    %c0_i32_0 = arith.constant 0 : i32
    %c0_i32_1 = arith.constant 0 : i32
    return %arg0, %c0_i32, %c0_i32_0 : i32, i32, i32
  }
}

</mosaic_0001>

<bundles_post_ra>
// kernel: tpu_custom_call.1
= control target key start
LH: loop header
LB: loop body
LE: loop exit
PB: predicated region body
PF: predicated region fallthrough
CT: control target
= control target key end

     0   :  { %7 = vsyncpa [#allocation3], 0  ;;  %s356_s0 = inlined_call_operand.hbm [shape: f32[16,32], index: 0, kind: input, shape index: {}]   ;;  %s357_s1 = inlined_call_operand.hbm [shape: f32[16,32], index: 1, kind: input, shape index: {}]   ;;  %s358_s2 = inlined_call_operand.hbm [shape: f32[1,8,128], index: 2, kind: output, shape index: {}]  }
   0x1   :  { %8 = vsyncpa [#allocation6], 0 }
   0x2   :  { %9 = vsyncpa [#allocation4], 0  ;;  %s321_s9 = smov [#allocation2]  }
   0x3   :  { %s15_s10 = sshll.u32 %s321_s9, 4  ;;  %s16_s10 = int_to_ptr.vmem [resolvable:$true] %s15_s10 }
   0x4   :  { %s263_s11 = scalar_lea.vmem %s16_s10, 256  ;;  %p268_p1 = scmp.lt.s32.totalorder %s16_s10, %s16_s10 }
   0x5   :  { %p264_p0 = scmp.ne.s32.totalorder %s16_s10, %s263_s11  ;;  %p269_p2 = scmp.lt.s32.totalorder %s263_s11, %s263_s11 }
   0x7   :  { %p270_p3 = por %p269_p2, %p268_p1 }
   0x9   :  { %p271_p4 = pnand %p270_p3, %p264_p0 }
   0xb   :  { %274 = shalt.err (!%p271_p4)
}
   0xc   :  { %s322_s12 = smov 128   ;;  %s323_s13 = smov 8  }
   0xd   :  { %21 = dma.hbm_to_vmem [thread:$0]  %s356_s0, 256, %s16_s10, [#allocation3], %s322_s12, %s322_s12, %s323_s13  }
   0xe   :  { %s324_s16 = smov [#allocation5]  }
   0xf   :  { %s27_s17 = sshll.u32 %s324_s16, 4  ;;  %s28_s17 = int_to_ptr.vmem [resolvable:$true] %s27_s17 }
  0x10   :  { %s283_s18 = scalar_lea.vmem %s28_s17, 256  ;;  %p288_p6 = scmp.lt.s32.totalorder %s28_s17, %s28_s17 }
  0x11   :  { %p284_p5 = scmp.ne.s32.totalorder %s28_s17, %s283_s18  ;;  %p289_p7 = scmp.lt.s32.totalorder %s283_s18, %s283_s18 }
  0x13   :  { %p290_p8 = por %p289_p7, %p288_p6 }
  0x15   :  { %p291_p9 = pnand %p290_p8, %p284_p5 }
  0x17   :  { %294 = shalt.err (!%p291_p9)
}
  0x18   :  { %33 = dma.hbm_to_vmem [thread:$0]  %s357_s1, 256, %s28_s17, [#allocation6], %s322_s12, %s322_s12, %s323_s13  }
  0x19   :  { %315 = dma.done.wait [#allocation3], 256  }
  0x1a   :  { %316 = vsyncadd [#allocation3], 4294967040 }
  0x1b   :  { %317 = dma.done.wait [#allocation6], 256  }
  0x1c   :  { %318 = vsyncadd [#allocation6], 4294967040  ;;  %vm47_vm0 = vcmask 261120   ;;  %v46_v0 = vld [vmem:[#allocation5 + $0x8] sm:$0xff]  ;;  %v45_v1 = vld [vmem:[#allocation5] sm:$0xff]  ;;  %v135_v6 = vlaneseq  ;;  %vm155_vm4 = vcmask 130048  }
  0x1d   :  { %v41_v2 = vld [vmem:[#allocation2] sm:$0xff]  ;;  %233 = vmatprep.subr.msk.mxu0 %vm47_vm0, %v46_v0  ;;  %v42_v4 = vld [vmem:[#allocation2 + $0x8] sm:$0xff]  ;;  %vm192_vm5 = vcmask 7168   ;;  %s325_s0 = smov [#allocation7]  }
  0x1e   :  { %v43_v3 = vmul.f32 2.0, %v41_v2  ;;  %234 = vmatpush3.xpose.msk.msra.mxu0 %vm47_vm0, %v46_v0  ;;  %v44_v5 = vmul.f32 2.0, %v42_v4  ;;  %v136_v7 = vshrl.u32 %v135_v6, 7  ;;  %v142_v9 = vand.u32 127, %v135_v6  ;;  %s213_s1 = sshll.u32 %s325_s0, 4  ;;  %s214_s1 = int_to_ptr.vmem [resolvable:$true] %s213_s1 }
  0x1f   :  { %235 = vmatprep.subr.msk.mxu0 %vm47_vm0, %v45_v1  ;;  %s295_s22 = scalar_lea.vmem %s214_s1, 128  ;;  %p300_p11 = scmp.lt.s32.totalorder %s214_s1, %s214_s1 }
  0x20   :  { %237 = vmatprep.mubr.msk.f32.mxu0 %vm47_vm0, %v43_v3  ;;  %v137_v8 = vadd.s32 8, %v136_v7  ;;  %vm162_vm2 = vcmp.eq.s32.totalorder %v142_v9, %v136_v7  ;;  %p296_p10 = scmp.ne.s32.totalorder %s214_s1, %s295_s22  ;;  %p301_p12 = scmp.lt.s32.totalorder %s295_s22, %s295_s22 }
  0x22   :  { %236 = vmatpush3.xpose.msk.msra.mxu0 %vm47_vm0, %v45_v1  ;;  %v228_v10 = vadd.s32 4294967288, %v137_v8  ;;  %vm151_vm3 = vcmp.eq.s32.totalorder %v142_v9, %v137_v8  ;;  %p302_p13 = por %p301_p12, %p300_p11 }
  0x24   :  { %vm152_vm1 = vcmp.eq.s32.totalorder %v142_v9, %v228_v10  ;;  %p303_p0 = pnand %p302_p13, %p296_p10 }
  0x25   :  { %238 = vmatmul.mubr.msk.f32.vlgmr.msra.gmra.mxu0 %vm47_vm0, %v44_v5 }
  0xe5   :  { %v239_v11 = vpop.f32.mrf.mxu0 }
  0xe6   :  { %v154_v12 = vsel %vm152_vm1, %v239_v11, 0.0  ;;  %v165_v16 = vsel %vm151_vm3, -1e+30, %v239_v11 }
  0xe7   :  { %v126_v13 = vpop.f32.mrf.mxu0  ;;  %v169_v17 = vsel %vm155_vm4, %v165_v16, -inf  ;;  %v159_v30 = vsel %vm155_vm4, %v154_v12, 0.0 }
  0xe8   :  { %v164_v14 = vsel %vm162_vm2, -1e+30, %v126_v13  ;;  %v153_v18 = vsel %vm151_vm3, %v126_v13, 0.0 }
  0xe9   :  { %v166_v15 = vsel %vm155_vm4, %v164_v14, -inf  ;;  %v156_v19 = vsel %vm155_vm4, %v153_v18, 0.0 }
  0xea   :  { %167 = vmax.xlane.f32.xlu0 %v166_v15 }
  0xee   :  { %170 = vmax.xlane.f32.xlu0 %v169_v17 }
  0xf2   :  { %157 = vadd.xlane.f32.xlu0 %v156_v19 }
 0x173   :  { %v168_v20 = vpop.xlane.xlu0 %167 }
 0x174   :  { %v172_v21 = vsub.f32 %v164_v14, %v168_v20 }
 0x176   :  { %v174_v22 = vmul.f32 1.442695, %v172_v21 }
 0x177   :  { %v171_v23 = vpop.xlane.xlu0 %170 }
 0x178   :  { %247 = vpow2.f32 %v174_v22  ;;  %v173_v24 = vsub.f32 %v165_v16, %v171_v23 }
 0x17a   :  { %v176_v25 = vmul.f32 1.442695, %v173_v24 }
 0x17b   :  { %v158_v38 = vpop.xlane.xlu0 %157 }
 0x17c   :  { %249 = vpow2.f32 %v176_v25 }
 0x185   :  { %v248_v26 = vpop.eup %247 }
 0x186   :  { %v178_v27 = vsel %vm155_vm4, %v248_v26, 0.0 }
 0x187   :  { %179 = vadd.xlane.f32.xlu1 %v178_v27 }
 0x189   :  { %v250_v28 = vpop.eup %249 }
 0x18a   :  { %v181_v29 = vsel %vm155_vm4, %v250_v28, 0.0 }
 0x18b   :  { %182 = vadd.xlane.f32.xlu1 %v181_v29 }
 0x18f   :  { %160 = vadd.xlane.f32.xlu1 %v159_v30 }
 0x210   :  { %v180_v31 = vpop.xlane.xlu1 %179 }
 0x211   :  { %251 = vlog2.f32 %v180_v31 }
 0x214   :  { %v183_v32 = vpop.xlane.xlu1 %182 }
 0x215   :  { %253 = vlog2.f32 %v183_v32 }
 0x218   :  { %v161_v41 = vpop.xlane.xlu1 %160 }
 0x21e   :  { %v252_v33 = vpop.eup %251 }
 0x21f   :  { %v185_v34 = vmul.f32 0.6931472, %v252_v33 }
 0x221   :  { %v188_v35 = vadd.f32 %v185_v34, %v168_v20 }
 0x222   :  { %v254_v36 = vpop.eup %253 }
 0x223   :  { %v187_v37 = vmul.f32 0.6931472, %v254_v36  ;;  %v190_v40 = vsub.f32 %v188_v35, %v158_v38 }
 0x225   :  { %v189_v39 = vadd.f32 %v187_v37, %v171_v23  ;;  %v193_v43 = vsel %vm192_vm5, %v190_v40, 0.0 }
 0x227   :  { %v191_v42 = vsub.f32 %v189_v39, %v161_v41 }
 0x229   :  { %v194_v44 = vsel %vm192_vm5, %v191_v42, 0.0 }
 0x22a   :  { %v195_v45 = vadd.f32 %v194_v44, %v193_v43 }
 0x22c   :  { %196 = vadd.xlane.f32.xlu0 %v195_v45 }
 0x2b5   :  { %v197_v46 = vpop.xlane.xlu0 %196 }
 0x2b6   :  { %v198_v47 = vrot.slane %v197_v46, 4 }
 0x2b8   :  { %v199_v48 = vadd.f32 %v198_v47, %v197_v46 }
 0x2ba   :  { %v200_v49 = vrot.slane %v199_v48, 2 }
 0x2bc   :  { %v201_v50 = vadd.f32 %v200_v49, %v199_v48 }
 0x2be   :  { %v202_v51 = vrot.slane %v201_v50, 1 }
 0x2c0   :  { %v203_v52 = vadd.f32 %v202_v51, %v201_v50 }
 0x2c2   :  { %240 = vpush %v203_v52 }
 0x2f3   :  { %s241_s21 = spop %240 }
 0x2f4   :  { %v205_v53 = vstv %s241_s21 }
 0x2f5   :  { %206 = vst [vmem:[#allocation7] sm:$0xff] %v205_v53 }
 0x2f6   :  { %306 = shalt.err (!%p303_p0)
}
 0x2f7   :  { %216 = dma.vmem_to_hbm [thread:$0]  %s214_s1, 128, %s358_s2, [#allocation4]  }
 0x2f8   :  { %319 = dma.done.wait [#allocation4], 128  }
 0x2f9   :  { %320 = vsyncadd [#allocation4], 4294967168 }
 0x2fa   :  { %220 = vsyncpa [#allocation3], 1 }
 0x2fb   :  { %221 = vsyncpa [#allocation6], 1 }
 0x2fc   :  { %222 = vsyncpa [#allocation4], 1 }

// kernel: tpu_custom_call.1
= control target key start
LH: loop header
LB: loop body
LE: loop exit
PB: predicated region body
PF: predicated region fallthrough
CT: control target
= control target key end

     0   :  { %7 = vsyncpa [#allocation3], 0  ;;  %s356_s0 = inlined_call_operand.hbm [shape: f32[16,32], index: 0, kind: input, shape index: {}]   ;;  %s357_s1 = inlined_call_operand.hbm [shape: f32[16,32], index: 1, kind: input, shape index: {}]   ;;  %s358_s2 = inlined_call_operand.hbm [shape: f32[1,8,128], index: 2, kind: output, shape index: {}]  }
   0x1   :  { %8 = vsyncpa [#allocation6], 0 }
   0x2   :  { %9 = vsyncpa [#allocation4], 0  ;;  %s321_s9 = smov [#allocation2]  }
   0x3   :  { %s15_s10 = sshll.u32 %s321_s9, 4  ;;  %s16_s10 = int_to_ptr.vmem [resolvable:$true] %s15_s10 }
   0x4   :  { %s263_s11 = scalar_lea.vmem %s16_s10, 256  ;;  %p268_p1 = scmp.lt.s32.totalorder %s16_s10, %s16_s10 }
   0x5   :  { %p264_p0 = scmp.ne.s32.totalorder %s16_s10, %s263_s11  ;;  %p269_p2 = scmp.lt.s32.totalorder %s263_s11, %s263_s11 }
   0x7   :  { %p270_p3 = por %p269_p2, %p268_p1 }
   0x9   :  { %p271_p4 = pnand %p270_p3, %p264_p0 }
   0xb   :  { %274 = shalt.err (!%p271_p4)
}
   0xc   :  { %s322_s12 = smov 128   ;;  %s323_s13 = smov 8  }
   0xd   :  { %21 = dma.hbm_to_vmem [thread:$0]  %s356_s0, 256, %s16_s10, [#allocation3], %s322_s12, %s322_s12, %s323_s13  }
   0xe   :  { %s324_s16 = smov [#allocation5]  }
   0xf   :  { %s27_s17 = sshll.u32 %s324_s16, 4  ;;  %s28_s17 = int_to_ptr.vmem [resolvable:$true] %s27_s17 }
  0x10   :  { %s283_s18 = scalar_lea.vmem %s28_s17, 256  ;;  %p288_p6 = scmp.lt.s32.totalorder %s28_s17, %s28_s17 }
  0x11   :  { %p284_p5 = scmp.ne.s32.totalorder %s28_s17, %s283_s18  ;;  %p289_p7 = scmp.lt.s32.totalorder %s283_s18, %s283_s18 }
  0x13   :  { %p290_p8 = por %p289_p7, %p288_p6 }
  0x15   :  { %p291_p9 = pnand %p290_p8, %p284_p5 }
  0x17   :  { %294 = shalt.err (!%p291_p9)
}
  0x18   :  { %33 = dma.hbm_to_vmem [thread:$0]  %s357_s1, 256, %s28_s17, [#allocation6], %s322_s12, %s322_s12, %s323_s13  }
  0x19   :  { %315 = dma.done.wait [#allocation3], 256  }
  0x1a   :  { %316 = vsyncadd [#allocation3], 4294967040 }
  0x1b   :  { %317 = dma.done.wait [#allocation6], 256  }
  0x1c   :  { %318 = vsyncadd [#allocation6], 4294967040  ;;  %vm47_vm0 = vcmask 261120   ;;  %v46_v0 = vld [vmem:[#allocation5 + $0x8] sm:$0xff]  ;;  %v45_v1 = vld [vmem:[#allocation5] sm:$0xff]  ;;  %v135_v6 = vlaneseq  ;;  %vm155_vm4 = vcmask 130048  }
  0x1d   :  { %v41_v2 = vld [vmem:[#allocation2] sm:$0xff]  ;;  %233 = vmatprep.subr.msk.mxu0 %vm47_vm0, %v46_v0  ;;  %v42_v4 = vld [vmem:[#allocation2 + $0x8] sm:$0xff]  ;;  %vm192_vm5 = vcmask 7168   ;;  %s325_s0 = smov [#allocation7]  }
  0x1e   :  { %v43_v3 = vmul.f32 2.0, %v41_v2  ;;  %234 = vmatpush3.xpose.msk.msra.mxu0 %vm47_vm0, %v46_v0  ;;  %v44_v5 = vmul.f32 2.0, %v42_v4  ;;  %v136_v7 = vshrl.u32 %v135_v6, 7  ;;  %v142_v9 = vand.u32 127, %v135_v6  ;;  %s213_s1 = sshll.u32 %s325_s0, 4  ;;  %s214_s1 = int_to_ptr.vmem [resolvable:$true] %s213_s1 }
  0x1f   :  { %235 = vmatprep.subr.msk.mxu0 %vm47_vm0, %v45_v1  ;;  %s295_s22 = scalar_lea.vmem %s214_s1, 128  ;;  %p300_p11 = scmp.lt.s32.totalorder %s214_s1, %s214_s1 }
  0x20   :  { %237 = vmatprep.mubr.msk.f32.mxu0 %vm47_vm0, %v43_v3  ;;  %v137_v8 = vadd.s32 8, %v136_v7  ;;  %vm162_vm2 = vcmp.eq.s32.totalorder %v142_v9, %v136_v7  ;;  %p296_p10 = scmp.ne.s32.totalorder %s214_s1, %s295_s22  ;;  %p301_p12 = scmp.lt.s32.totalorder %s295_s22, %s295_s22 }
  0x22   :  { %236 = vmatpush3.xpose.msk.msra.mxu0 %vm47_vm0, %v45_v1  ;;  %v228_v10 = vadd.s32 4294967288, %v137_v8  ;;  %vm151_vm3 = vcmp.eq.s32.totalorder %v142_v9, %v137_v8  ;;  %p302_p13 = por %p301_p12, %p300_p11 }
  0x24   :  { %vm152_vm1 = vcmp.eq.s32.totalorder %v142_v9, %v228_v10  ;;  %p303_p0 = pnand %p302_p13, %p296_p10 }
  0x25   :  { %238 = vmatmul.mubr.msk.f32.vlgmr.msra.gmra.mxu0 %vm47_vm0, %v44_v5 }
  0xe5   :  { %v239_v11 = vpop.f32.mrf.mxu0 }
  0xe6   :  { %v154_v12 = vsel %vm152_vm1, %v239_v11, 0.0  ;;  %v165_v16 = vsel %vm151_vm3, -1e+30, %v239_v11 }
  0xe7   :  { %v126_v13 = vpop.f32.mrf.mxu0  ;;  %v169_v17 = vsel %vm155_vm4, %v165_v16, -inf  ;;  %v159_v30 = vsel %vm155_vm4, %v154_v12, 0.0 }
  0xe8   :  { %v164_v14 = vsel %vm162_vm2, -1e+30, %v126_v13  ;;  %v153_v18 = vsel %vm151_vm3, %v126_v13, 0.0 }
  0xe9   :  { %v166_v15 = vsel %vm155_vm4, %v164_v14, -inf  ;;  %v156_v19 = vsel %vm155_vm4, %v153_v18, 0.0 }
  0xea   :  { %167 = vmax.xlane.f32.xlu0 %v166_v15 }
  0xee   :  { %170 = vmax.xlane.f32.xlu0 %v169_v17 }
  0xf2   :  { %157 = vadd.xlane.f32.xlu0 %v156_v19 }
 0x173   :  { %v168_v20 = vpop.xlane.xlu0 %167 }
 0x174   :  { %v172_v21 = vsub.f32 %v164_v14, %v168_v20 }
 0x176   :  { %v174_v22 = vmul.f32 1.442695, %v172_v21 }
 0x177   :  { %v171_v23 = vpop.xlane.xlu0 %170 }
 0x178   :  { %247 = vpow2.f32 %v174_v22  ;;  %v173_v24 = vsub.f32 %v165_v16, %v171_v23 }
 0x17a   :  { %v176_v25 = vmul.f32 1.442695, %v173_v24 }
 0x17b   :  { %v158_v38 = vpop.xlane.xlu0 %157 }
 0x17c   :  { %249 = vpow2.f32 %v176_v25 }
 0x185   :  { %v248_v26 = vpop.eup %247 }
 0x186   :  { %v178_v27 = vsel %vm155_vm4, %v248_v26, 0.0 }
 0x187   :  { %179 = vadd.xlane.f32.xlu1 %v178_v27 }
 0x189   :  { %v250_v28 = vpop.eup %249 }
 0x18a   :  { %v181_v29 = vsel %vm155_vm4, %v250_v28, 0.0 }
 0x18b   :  { %182 = vadd.xlane.f32.xlu1 %v181_v29 }
 0x18f   :  { %160 = vadd.xlane.f32.xlu1 %v159_v30 }
 0x210   :  { %v180_v31 = vpop.xlane.xlu1 %179 }
 0x211   :  { %251 = vlog2.f32 %v180_v31 }
 0x214   :  { %v183_v32 = vpop.xlane.xlu1 %182 }
 0x215   :  { %253 = vlog2.f32 %v183_v32 }
 0x218   :  { %v161_v41 = vpop.xlane.xlu1 %160 }
 0x21e   :  { %v252_v33 = vpop.eup %251 }
 0x21f   :  { %v185_v34 = vmul.f32 0.6931472, %v252_v33 }
 0x221   :  { %v188_v35 = vadd.f32 %v185_v34, %v168_v20 }
 0x222   :  { %v254_v36 = vpop.eup %253 }
 0x223   :  { %v187_v37 = vmul.f32 0.6931472, %v254_v36  ;;  %v190_v40 = vsub.f32 %v188_v35, %v158_v38 }
 0x225   :  { %v189_v39 = vadd.f32 %v187_v37, %v171_v23  ;;  %v193_v43 = vsel %vm192_vm5, %v190_v40, 0.0 }
 0x227   :  { %v191_v42 = vsub.f32 %v189_v39, %v161_v41 }
 0x229   :  { %v194_v44 = vsel %vm192_vm5, %v191_v42, 0.0 }
 0x22a   :  { %v195_v45 = vadd.f32 %v194_v44, %v193_v43 }
 0x22c   :  { %196 = vadd.xlane.f32.xlu0 %v195_v45 }
 0x2b5   :  { %v197_v46 = vpop.xlane.xlu0 %196 }
 0x2b6   :  { %v198_v47 = vrot.slane %v197_v46, 4 }
 0x2b8   :  { %v199_v48 = vadd.f32 %v198_v47, %v197_v46 }
 0x2ba   :  { %v200_v49 = vrot.slane %v199_v48, 2 }
 0x2bc   :  { %v201_v50 = vadd.f32 %v200_v49, %v199_v48 }
 0x2be   :  { %v202_v51 = vrot.slane %v201_v50, 1 }
 0x2c0   :  { %v203_v52 = vadd.f32 %v202_v51, %v201_v50 }
 0x2c2   :  { %240 = vpush %v203_v52 }
 0x2f3   :  { %s241_s21 = spop %240 }
 0x2f4   :  { %v205_v53 = vstv %s241_s21 }
 0x2f5   :  { %206 = vst [vmem:[#allocation7] sm:$0xff] %v205_v53 }
 0x2f6   :  { %306 = shalt.err (!%p303_p0)
}
 0x2f7   :  { %216 = dma.vmem_to_hbm [thread:$0]  %s214_s1, 128, %s358_s2, [#allocation4]  }
 0x2f8   :  { %319 = dma.done.wait [#allocation4], 128  }
 0x2f9   :  { %320 = vsyncadd [#allocation4], 4294967168 }
 0x2fa   :  { %220 = vsyncpa [#allocation3], 1 }
 0x2fb   :  { %221 = vsyncpa [#allocation6], 1 }
 0x2fc   :  { %222 = vsyncpa [#allocation4], 1 }

</bundles_post_ra>
